<compile_context>
chip_gen: v7x
topology: tpu7x:2x2x1
jax: 0.10.0
libtpu: 0.0.40
codegen_flags: <defaults>
</compile_context>

<pallas_src>
import functools
import math

import jax
import jax.numpy as jnp
from jax.experimental import pallas as pl
from jax.experimental.pallas import tpu as pltpu


def _softmax_attention_kernel(q_ref, k_ref, v_ref, bias_ref, o_ref, *, scale):
    # q_ref/k_ref/v_ref: [1, H, S, D]   bias_ref: [1, 1, S] (f32 additive bias)
    # o_ref: [1, S, H*D]  (lane-dense output slab)
    _, H, S, D = q_ref.shape
    bias = bias_ref[0]  # [1, S], f32, 0 where kept / -1e6 where masked

    outs = []
    for h in range(H):          # static unroll over heads (H is small)
        qh = q_ref[0, h]        # [S, D], native dtype straight to the MXU
        kh = k_ref[0, h]        # [S, D]
        vh = v_ref[0, h]        # [S, D]

        # scores[q, k] = sum_d Q[q, d] * K[k, d]   (f32 accumulation)
        s = jnp.einsum("qd,kd->qk", qh, kh,
                       preferred_element_type=jnp.float32)
        s = s * scale + bias    # single mul + precomputed additive mask bias

        # numerically-stable softmax over keys, all in f32 (v5e-safe)
        m = jnp.max(s, axis=-1, keepdims=True)
        e = jnp.exp(s - m)
        den = jnp.sum(e, axis=-1, keepdims=True)
        attn = e * pl.reciprocal(den, approx=True)   # EUP vrcp, VALU stays free

        # dropout (p=attention_dropout) is identity in eval mode — no-op here.

        outs.append(jnp.dot(attn.astype(vh.dtype), vh,
                            preferred_element_type=jnp.float32))  # [S, D]

    # Lane-dense store: concat heads along lanes -> [S, H*D] = [16, 128]
    o_ref[0] = jnp.concatenate(outs, axis=-1).astype(o_ref.dtype)


def softmax_attention(Q, K, V, mask, head_dim):
    """Q, K, V: [B, H, S, D]; mask: [B, S] (1 = keep, 0 = masked). Returns [B, H, S, D]."""
    B, H, S, D = Q.shape
    scale = 1.0 / math.sqrt(head_dim)
    # Additive bias precomputed once: 0 where kept, -1e6 where masked
    # (identical values to the reference's `- 1e6 * (1 - mask)`).
    bias = ((mask.astype(jnp.float32) - 1.0) * 1000000.0).reshape(B, 1, S)

    kernel = functools.partial(_softmax_attention_kernel, scale=scale)

    out_lane = pl.pallas_call(
        kernel,
        out_shape=jax.ShapeDtypeStruct((B, S, H * D), Q.dtype),
        grid_spec=pltpu.PrefetchScalarGridSpec(
            num_scalar_prefetch=0,
            grid=(B,),
            in_specs=[
                pl.BlockSpec((1, H, S, D), lambda b: (b, 0, 0, 0)),
                pl.BlockSpec((1, H, S, D), lambda b: (b, 0, 0, 0)),
                pl.BlockSpec((1, H, S, D), lambda b: (b, 0, 0, 0)),
                pl.BlockSpec((1, 1, S), lambda b: (b, 0, 0)),
            ],
            out_specs=pl.BlockSpec((1, S, H * D), lambda b: (b, 0, 0)),
        ),
        compiler_params=pltpu.CompilerParams(
            dimension_semantics=("parallel",)),
    )(Q, K, V, bias)

    # Layout plumbing back to the module's [B, H, S, D] convention.
    return out_lane.reshape(B, S, H, D).transpose(0, 2, 1, 3)


def softmax_attention_ref(Q, K, V, mask, head_dim):
    """Pure-JAX reference mirroring the PyTorch forward exactly."""
    dot = jnp.einsum("bhqd,bhkd->bhqk", Q, K)
    dot = dot / math.sqrt(head_dim)
    dot = dot - 1000000.0 * (1.0 - mask[:, None, None, :])
    attn = jax.nn.softmax(dot, axis=-1)
    return jnp.einsum("bhqk,bhkd->bhqd", attn, V)


if __name__ == "__main__":
    # config = {'attention_dropout': 0.0, 'head_dim': 32}
    B, H, S, D = 2, 4, 16, 32
    head_dim = D

    key = jax.random.PRNGKey(0)
    kq, kk, kv, km = jax.random.split(key, 4)
    Q = jax.random.normal(kq, (B, H, S, D), dtype=jnp.float32)
    K = jax.random.normal(kk, (B, H, S, D), dtype=jnp.float32)
    V = jax.random.normal(kv, (B, H, S, D), dtype=jnp.float32)
    # binary mask, last few key positions of batch 1 masked out
    mask = jnp.ones((B, S), dtype=jnp.float32)
    mask = mask.at[1, S - 4:].set(0.0)

    out = softmax_attention(Q, K, V, mask, head_dim)
    out = jax.block_until_ready(out)

    ref = softmax_attention_ref(Q, K, V, mask, head_dim)
    assert out.shape == (B, H, S, D)
    # tolerance accommodates the EUP approximate-reciprocal softmax normalization
    assert jnp.allclose(out, ref, atol=2e-3, rtol=2e-3), "mismatch vs reference"

    print("KERNEL_OK")
</pallas_src>

<mosaic_0001>
module attributes {stable_mosaic.version = 11 : i64} {
  func.func @_softmax_attention_kernel(%arg0: i32, %arg1: memref<1x4x16x32xf32, #tpu.memory_space<vmem>>, %arg2: memref<1x4x16x32xf32, #tpu.memory_space<vmem>>, %arg3: memref<1x4x16x32xf32, #tpu.memory_space<vmem>>, %arg4: memref<1x1x16xf32, #tpu.memory_space<vmem>>, %arg5: memref<1x16x128xf32, #tpu.memory_space<vmem>>) attributes {dimension_semantics = [#tpu.dimension_semantics<parallel>], iteration_bounds = array<i64: 2>, scalar_prefetch = 0 : i64, scratch_operands = 0 : i64, tpu.core_type = #tpu.core_type<tc>, window_params = [{transform_indices = @transform_0, window_bounds = array<i64: 1, 4, 16, 32>}, {transform_indices = @transform_1, window_bounds = array<i64: 1, 4, 16, 32>}, {transform_indices = @transform_2, window_bounds = array<i64: 1, 4, 16, 32>}, {transform_indices = @transform_3, window_bounds = array<i64: 1, 1, 16>}, {transform_indices = @transform_4, window_bounds = array<i64: 1, 16, 128>}]} {
    %c0 = arith.constant 0 : index
    %c0_0 = arith.constant 0 : index
    %c0_1 = arith.constant 0 : index
    %0 = vector.load %arg4[%c0, %c0_0, %c0_1] : memref<1x1x16xf32, #tpu.memory_space<vmem>>, vector<1x1x16xf32>
    %1 = vector.shape_cast %0 : vector<1x1x16xf32> to vector<1x16xf32>
    %c0_2 = arith.constant 0 : index
    %c0_3 = arith.constant 0 : index
    %c0_4 = arith.constant 0 : index
    %c0_5 = arith.constant 0 : index
    %2 = vector.load %arg1[%c0_2, %c0_3, %c0_4, %c0_5] : memref<1x4x16x32xf32, #tpu.memory_space<vmem>>, vector<1x1x16x32xf32>
    %3 = vector.shape_cast %2 : vector<1x1x16x32xf32> to vector<16x32xf32>
    %c0_6 = arith.constant 0 : index
    %c0_7 = arith.constant 0 : index
    %c0_8 = arith.constant 0 : index
    %c0_9 = arith.constant 0 : index
    %4 = vector.load %arg2[%c0_6, %c0_7, %c0_8, %c0_9] : memref<1x4x16x32xf32, #tpu.memory_space<vmem>>, vector<1x1x16x32xf32>
    %5 = vector.shape_cast %4 : vector<1x1x16x32xf32> to vector<16x32xf32>
    %c0_10 = arith.constant 0 : index
    %c0_11 = arith.constant 0 : index
    %c0_12 = arith.constant 0 : index
    %c0_13 = arith.constant 0 : index
    %6 = vector.load %arg3[%c0_10, %c0_11, %c0_12, %c0_13] : memref<1x4x16x32xf32, #tpu.memory_space<vmem>>, vector<1x1x16x32xf32>
    %7 = vector.shape_cast %6 : vector<1x1x16x32xf32> to vector<16x32xf32>
    "tpu.trace_start"() <{level = 10 : i32, message = "qd,kd->qk"}> : () -> ()
    %cst = arith.constant dense<0.000000e+00> : vector<16x16xf32>
    %8 = tpu.matmul %3, %5, %cst {dimension_numbers = #tpu.dot_dimension_numbers<[1], [1], [0], [0], [0, 0, 1, 0], [], []>} : vector<16x32xf32>, vector<16x32xf32>, vector<16x16xf32> -> vector<16x16xf32>
    "tpu.trace_stop"() : () -> ()
    %cst_14 = arith.constant 0.176776692 : f32
    %9 = vector.broadcast %cst_14 : f32 to vector<16x16xf32>
    %10 = arith.mulf %8, %9 : vector<16x16xf32>
    %11 = vector.broadcast %1 : vector<1x16xf32> to vector<16x16xf32>
    %12 = arith.addf %10, %11 : vector<16x16xf32>
    %cst_15 = arith.constant dense<0xFF800000> : vector<16xf32>
    %13 = vector.multi_reduction <maximumf>, %12, %cst_15 [1] : vector<16x16xf32> to vector<16xf32>
    %14 = vector.shape_cast %13 : vector<16xf32> to vector<16x1xf32>
    %15 = vector.broadcast %14 : vector<16x1xf32> to vector<16x16xf32>
    %16 = arith.subf %12, %15 : vector<16x16xf32>
    %17 = math.exp %16 : vector<16x16xf32>
    %cst_16 = arith.constant dense<0.000000e+00> : vector<16xf32>
    %18 = vector.multi_reduction <add>, %17, %cst_16 [1] : vector<16x16xf32> to vector<16xf32>
    %19 = vector.shape_cast %18 : vector<16xf32> to vector<16x1xf32>
    %20 = tpu.reciprocal %19 {approx = true} : vector<16x1xf32> -> vector<16x1xf32>
    %21 = vector.broadcast %20 : vector<16x1xf32> to vector<16x16xf32>
    %22 = arith.mulf %17, %21 : vector<16x16xf32>
    %cst_17 = arith.constant dense<0.000000e+00> : vector<16x32xf32>
    %23 = tpu.matmul %22, %7, %cst_17 {dimension_numbers = #tpu.dot_dimension_numbers<[1], [0], [0], [1], [0, 0, 1, 1], [], []>} : vector<16x16xf32>, vector<16x32xf32>, vector<16x32xf32> -> vector<16x32xf32>
    %c0_18 = arith.constant 0 : index
    %c1 = arith.constant 1 : index
    %c0_19 = arith.constant 0 : index
    %c0_20 = arith.constant 0 : index
    %24 = vector.load %arg1[%c0_18, %c1, %c0_19, %c0_20] : memref<1x4x16x32xf32, #tpu.memory_space<vmem>>, vector<1x1x16x32xf32>
    %25 = vector.shape_cast %24 : vector<1x1x16x32xf32> to vector<16x32xf32>
    %c0_21 = arith.constant 0 : index
    %c1_22 = arith.constant 1 : index
    %c0_23 = arith.constant 0 : index
    %c0_24 = arith.constant 0 : index
    %26 = vector.load %arg2[%c0_21, %c1_22, %c0_23, %c0_24] : memref<1x4x16x32xf32, #tpu.memory_space<vmem>>, vector<1x1x16x32xf32>
    %27 = vector.shape_cast %26 : vector<1x1x16x32xf32> to vector<16x32xf32>
    %c0_25 = arith.constant 0 : index
    %c1_26 = arith.constant 1 : index
    %c0_27 = arith.constant 0 : index
    %c0_28 = arith.constant 0 : index
    %28 = vector.load %arg3[%c0_25, %c1_26, %c0_27, %c0_28] : memref<1x4x16x32xf32, #tpu.memory_space<vmem>>, vector<1x1x16x32xf32>
    %29 = vector.shape_cast %28 : vector<1x1x16x32xf32> to vector<16x32xf32>
    "tpu.trace_start"() <{level = 10 : i32, message = "qd,kd->qk"}> : () -> ()
    %cst_29 = arith.constant dense<0.000000e+00> : vector<16x16xf32>
    %30 = tpu.matmul %25, %27, %cst_29 {dimension_numbers = #tpu.dot_dimension_numbers<[1], [1], [0], [0], [0, 0, 1, 0], [], []>} : vector<16x32xf32>, vector<16x32xf32>, vector<16x16xf32> -> vector<16x16xf32>
    "tpu.trace_stop"() : () -> ()
    %cst_30 = arith.constant 0.176776692 : f32
    %31 = vector.broadcast %cst_30 : f32 to vector<16x16xf32>
    %32 = arith.mulf %30, %31 : vector<16x16xf32>
    %33 = vector.broadcast %1 : vector<1x16xf32> to vector<16x16xf32>
    %34 = arith.addf %32, %33 : vector<16x16xf32>
    %cst_31 = arith.constant dense<0xFF800000> : vector<16xf32>
    %35 = vector.multi_reduction <maximumf>, %34, %cst_31 [1] : vector<16x16xf32> to vector<16xf32>
    %36 = vector.shape_cast %35 : vector<16xf32> to vector<16x1xf32>
    %37 = vector.broadcast %36 : vector<16x1xf32> to vector<16x16xf32>
    %38 = arith.subf %34, %37 : vector<16x16xf32>
    %39 = math.exp %38 : vector<16x16xf32>
    %cst_32 = arith.constant dense<0.000000e+00> : vector<16xf32>
    %40 = vector.multi_reduction <add>, %39, %cst_32 [1] : vector<16x16xf32> to vector<16xf32>
    %41 = vector.shape_cast %40 : vector<16xf32> to vector<16x1xf32>
    %42 = tpu.reciprocal %41 {approx = true} : vector<16x1xf32> -> vector<16x1xf32>
    %43 = vector.broadcast %42 : vector<16x1xf32> to vector<16x16xf32>
    %44 = arith.mulf %39, %43 : vector<16x16xf32>
    %cst_33 = arith.constant dense<0.000000e+00> : vector<16x32xf32>
    %45 = tpu.matmul %44, %29, %cst_33 {dimension_numbers = #tpu.dot_dimension_numbers<[1], [0], [0], [1], [0, 0, 1, 1], [], []>} : vector<16x16xf32>, vector<16x32xf32>, vector<16x32xf32> -> vector<16x32xf32>
    %c0_34 = arith.constant 0 : index
    %c2 = arith.constant 2 : index
    %c0_35 = arith.constant 0 : index
    %c0_36 = arith.constant 0 : index
    %46 = vector.load %arg1[%c0_34, %c2, %c0_35, %c0_36] : memref<1x4x16x32xf32, #tpu.memory_space<vmem>>, vector<1x1x16x32xf32>
    %47 = vector.shape_cast %46 : vector<1x1x16x32xf32> to vector<16x32xf32>
    %c0_37 = arith.constant 0 : index
    %c2_38 = arith.constant 2 : index
    %c0_39 = arith.constant 0 : index
    %c0_40 = arith.constant 0 : index
    %48 = vector.load %arg2[%c0_37, %c2_38, %c0_39, %c0_40] : memref<1x4x16x32xf32, #tpu.memory_space<vmem>>, vector<1x1x16x32xf32>
    %49 = vector.shape_cast %48 : vector<1x1x16x32xf32> to vector<16x32xf32>
    %c0_41 = arith.constant 0 : index
    %c2_42 = arith.constant 2 : index
    %c0_43 = arith.constant 0 : index
    %c0_44 = arith.constant 0 : index
    %50 = vector.load %arg3[%c0_41, %c2_42, %c0_43, %c0_44] : memref<1x4x16x32xf32, #tpu.memory_space<vmem>>, vector<1x1x16x32xf32>
    %51 = vector.shape_cast %50 : vector<1x1x16x32xf32> to vector<16x32xf32>
    "tpu.trace_start"() <{level = 10 : i32, message = "qd,kd->qk"}> : () -> ()
    %cst_45 = arith.constant dense<0.000000e+00> : vector<16x16xf32>
    %52 = tpu.matmul %47, %49, %cst_45 {dimension_numbers = #tpu.dot_dimension_numbers<[1], [1], [0], [0], [0, 0, 1, 0], [], []>} : vector<16x32xf32>, vector<16x32xf32>, vector<16x16xf32> -> vector<16x16xf32>
    "tpu.trace_stop"() : () -> ()
    %cst_46 = arith.constant 0.176776692 : f32
    %53 = vector.broadcast %cst_46 : f32 to vector<16x16xf32>
    %54 = arith.mulf %52, %53 : vector<16x16xf32>
    %55 = vector.broadcast %1 : vector<1x16xf32> to vector<16x16xf32>
    %56 = arith.addf %54, %55 : vector<16x16xf32>
    %cst_47 = arith.constant dense<0xFF800000> : vector<16xf32>
    %57 = vector.multi_reduction <maximumf>, %56, %cst_47 [1] : vector<16x16xf32> to vector<16xf32>
    %58 = vector.shape_cast %57 : vector<16xf32> to vector<16x1xf32>
    %59 = vector.broadcast %58 : vector<16x1xf32> to vector<16x16xf32>
    %60 = arith.subf %56, %59 : vector<16x16xf32>
    %61 = math.exp %60 : vector<16x16xf32>
    %cst_48 = arith.constant dense<0.000000e+00> : vector<16xf32>
    %62 = vector.multi_reduction <add>, %61, %cst_48 [1] : vector<16x16xf32> to vector<16xf32>
    %63 = vector.shape_cast %62 : vector<16xf32> to vector<16x1xf32>
    %64 = tpu.reciprocal %63 {approx = true} : vector<16x1xf32> -> vector<16x1xf32>
    %65 = vector.broadcast %64 : vector<16x1xf32> to vector<16x16xf32>
    %66 = arith.mulf %61, %65 : vector<16x16xf32>
    %cst_49 = arith.constant dense<0.000000e+00> : vector<16x32xf32>
    %67 = tpu.matmul %66, %51, %cst_49 {dimension_numbers = #tpu.dot_dimension_numbers<[1], [0], [0], [1], [0, 0, 1, 1], [], []>} : vector<16x16xf32>, vector<16x32xf32>, vector<16x32xf32> -> vector<16x32xf32>
    %c0_50 = arith.constant 0 : index
    %c3 = arith.constant 3 : index
    %c0_51 = arith.constant 0 : index
    %c0_52 = arith.constant 0 : index
    %68 = vector.load %arg1[%c0_50, %c3, %c0_51, %c0_52] : memref<1x4x16x32xf32, #tpu.memory_space<vmem>>, vector<1x1x16x32xf32>
    %69 = vector.shape_cast %68 : vector<1x1x16x32xf32> to vector<16x32xf32>
    %c0_53 = arith.constant 0 : index
    %c3_54 = arith.constant 3 : index
    %c0_55 = arith.constant 0 : index
    %c0_56 = arith.constant 0 : index
    %70 = vector.load %arg2[%c0_53, %c3_54, %c0_55, %c0_56] : memref<1x4x16x32xf32, #tpu.memory_space<vmem>>, vector<1x1x16x32xf32>
    %71 = vector.shape_cast %70 : vector<1x1x16x32xf32> to vector<16x32xf32>
    %c0_57 = arith.constant 0 : index
    %c3_58 = arith.constant 3 : index
    %c0_59 = arith.constant 0 : index
    %c0_60 = arith.constant 0 : index
    %72 = vector.load %arg3[%c0_57, %c3_58, %c0_59, %c0_60] : memref<1x4x16x32xf32, #tpu.memory_space<vmem>>, vector<1x1x16x32xf32>
    %73 = vector.shape_cast %72 : vector<1x1x16x32xf32> to vector<16x32xf32>
    "tpu.trace_start"() <{level = 10 : i32, message = "qd,kd->qk"}> : () -> ()
    %cst_61 = arith.constant dense<0.000000e+00> : vector<16x16xf32>
    %74 = tpu.matmul %69, %71, %cst_61 {dimension_numbers = #tpu.dot_dimension_numbers<[1], [1], [0], [0], [0, 0, 1, 0], [], []>} : vector<16x32xf32>, vector<16x32xf32>, vector<16x16xf32> -> vector<16x16xf32>
    "tpu.trace_stop"() : () -> ()
    %cst_62 = arith.constant 0.176776692 : f32
    %75 = vector.broadcast %cst_62 : f32 to vector<16x16xf32>
    %76 = arith.mulf %74, %75 : vector<16x16xf32>
    %77 = vector.broadcast %1 : vector<1x16xf32> to vector<16x16xf32>
    %78 = arith.addf %76, %77 : vector<16x16xf32>
    %cst_63 = arith.constant dense<0xFF800000> : vector<16xf32>
    %79 = vector.multi_reduction <maximumf>, %78, %cst_63 [1] : vector<16x16xf32> to vector<16xf32>
    %80 = vector.shape_cast %79 : vector<16xf32> to vector<16x1xf32>
    %81 = vector.broadcast %80 : vector<16x1xf32> to vector<16x16xf32>
    %82 = arith.subf %78, %81 : vector<16x16xf32>
    %83 = math.exp %82 : vector<16x16xf32>
    %cst_64 = arith.constant dense<0.000000e+00> : vector<16xf32>
    %84 = vector.multi_reduction <add>, %83, %cst_64 [1] : vector<16x16xf32> to vector<16xf32>
    %85 = vector.shape_cast %84 : vector<16xf32> to vector<16x1xf32>
    %86 = tpu.reciprocal %85 {approx = true} : vector<16x1xf32> -> vector<16x1xf32>
    %87 = vector.broadcast %86 : vector<16x1xf32> to vector<16x16xf32>
    %88 = arith.mulf %83, %87 : vector<16x16xf32>
    %cst_65 = arith.constant dense<0.000000e+00> : vector<16x32xf32>
    %89 = tpu.matmul %88, %73, %cst_65 {dimension_numbers = #tpu.dot_dimension_numbers<[1], [0], [0], [1], [0, 0, 1, 1], [], []>} : vector<16x16xf32>, vector<16x32xf32>, vector<16x32xf32> -> vector<16x32xf32>
    %90 = tpu.concatenate %23, %45, %67, %89 in 1 : vector<16x32xf32>, vector<16x32xf32>, vector<16x32xf32>, vector<16x32xf32> -> vector<16x128xf32>
    %c0_66 = arith.constant 0 : index
    %c0_67 = arith.constant 0 : index
    %c0_68 = arith.constant 0 : index
    %91 = vector.load %arg5[%c0_66, %c0_67, %c0_68] : memref<1x16x128xf32, #tpu.memory_space<vmem>>, vector<1x16x128xf32>
    %92 = vector.shape_cast %91 : vector<1x16x128xf32> to vector<16x128xf32>
    %93 = vector.shape_cast %90 : vector<16x128xf32> to vector<1x16x128xf32>
    tpu.vector_store %arg5[%c0_66, %c0_67, %c0_68], %93 {strides = array<i32>} : memref<1x16x128xf32, #tpu.memory_space<vmem>>, vector<1x16x128xf32>,
    return
  }
  func.func @transform_0(%arg0: i32) -> (i32, i32, i32, i32) {
    %c0_i32 = arith.constant 0 : i32
    %c0_i32_0 = arith.constant 0 : i32
    %c0_i32_1 = arith.constant 0 : i32
    %c0_i32_2 = arith.constant 0 : i32
    return %arg0, %c0_i32, %c0_i32_0, %c0_i32_1 : i32, i32, i32, i32
  }
  func.func @transform_1(%arg0: i32) -> (i32, i32, i32, i32) {
    %c0_i32 = arith.constant 0 : i32
    %c0_i32_0 = arith.constant 0 : i32
    %c0_i32_1 = arith.constant 0 : i32
    %c0_i32_2 = arith.constant 0 : i32
    return %arg0, %c0_i32, %c0_i32_0, %c0_i32_1 : i32, i32, i32, i32
  }
  func.func @transform_2(%arg0: i32) -> (i32, i32, i32, i32) {
    %c0_i32 = arith.constant 0 : i32
    %c0_i32_0 = arith.constant 0 : i32
    %c0_i32_1 = arith.constant 0 : i32
    %c0_i32_2 = arith.constant 0 : i32
    return %arg0, %c0_i32, %c0_i32_0, %c0_i32_1 : i32, i32, i32, i32
  }
  func.func @transform_3(%arg0: i32) -> (i32, i32, i32) {
    %c0_i32 = arith.constant 0 : i32
    %c0_i32_0 = arith.constant 0 : i32
    %c0_i32_1 = arith.constant 0 : i32
    return %arg0, %c0_i32, %c0_i32_0 : i32, i32, i32
  }
  func.func @transform_4(%arg0: i32) -> (i32, i32, i32) {
    %c0_i32 = arith.constant 0 : i32
    %c0_i32_0 = arith.constant 0 : i32
    %c0_i32_1 = arith.constant 0 : i32
    return %arg0, %c0_i32, %c0_i32_0 : i32, i32, i32
  }
}

</mosaic_0001>

<bundles_post_ra>
// kernel: tpu_custom_call.1
= control target key start
LH: loop header
LB: loop body
LE: loop exit
PB: predicated region body
PF: predicated region fallthrough
CT: control target
= control target key end

     0   :  { %s2162_s0 = inlined_call_operand.hbm [shape: f32[2,4,16,32], index: 0, kind: input, shape index: {}]   ;;  %s2163_s1 = inlined_call_operand.hbm [shape: f32[2,4,16,32], index: 1, kind: input, shape index: {}]   ;;  %s2164_s2 = inlined_call_operand.hbm [shape: f32[2,4,16,32], index: 2, kind: input, shape index: {}]   ;;  %s2165_s3 = inlined_call_operand.vmem [shape: f32[2,1,16], index: 3, kind: input, shape index: {}]   ;;  %s2166_s4 = inlined_call_operand.hbm [shape: f32[2,16,128], index: 4, kind: output, shape index: {}]  }
   0x1   :  { %2173 = sst [smem:[#allocation12_spill]] %s2162_s0 }
   0x2   :  { %2174 = sst [smem:[#allocation13_spill]] %s2163_s1 }
   0x3   :  { %9 = vsyncpa [#allocation3], 0 }
   0x4   :  { %11 = vsyncpa [#allocation3 + $0x1], 0 }
   0x5   :  { %12 = vsyncpa [#allocation6], 0 }
   0x6   :  { %14 = vsyncpa [#allocation6 + $0x1], 0 }
   0x7   :  { %15 = vsyncpa [#allocation4], 0 }
   0x8   :  { %17 = vsyncpa [#allocation4 + $0x1], 0  ;;  %s1788_s15 = smov 0   ;;  %s1790_s16 = smov 0  }
   0x9   :  { %s1792_s17 = smov 0   ;;  %s1794_s18 = smov 0  }
   0xa LB: > { %s1809_s19 = sadd.s32 4294967295, %s1750_s18   ;;  %s1298_s20 = sadd.s32 4294967294, %s1750_s18   ;;  %s1750_s18 = sphi %s1794_s18, %s2196_s18   ;;  %s1746_s17 = sphi %s1792_s17, %s2195_s17   ;;  %s1742_s16 = sphi %s1790_s16, %s2194_s16   ;;  %s1738_s15 = sphi %s1788_s15, %s2193_s15  }
   0xb   : > { %s1813_s21 = sadd.s32 1, %s1750_s18   ;;  %s30_s22 = sadd.s32 1, %s1746_s17 }
   0xc   : > { %s27_s23 = ssub.s32 %s1750_s18, %s1813_s21  ;;  %p37_p0 = scmp.ne.s32.totalorder %s1746_s17, %s1742_s16 }
   0xd   : > { %p28_p1 = scmp.eq.s32.totalorder %s27_s23, 0  ;;  %p38_p2 = scmp.eq.s32.totalorder %s1750_s18, 0 }
   0xe   : > { %p43_p3 = scmp.ne.s32.totalorder %s1742_s16, %s1738_s15  ;;  %p44_p4 = scmp.eq.s32.totalorder %s1809_s19, 0 }
   0xf   : > { %s1825_s24 = scalar_select %p28_p1, %s1746_s17, %s30_s22  }
  0x10   : > { %p39_p5 = por %p38_p2, %p37_p0  ;;  %p1827_p6 = por %p44_p4, %p43_p3 }
  0x11   : > { %p145_p7 = scmp.eq.s32.totalorder %s1809_s19, 1  ;;  %p151_p8 = scmp.eq.s32.totalorder %s1298_s20, 1 }
  0x12   : > { %s2175_s25 = scalar_select %p1827_p6, 1, 0 }
  0x13   : > { %p1517_p10 = scmp.lt.s32.totalorder %s1750_s18, 2  ;;  %p1834_p11 = por %p145_p7, %p37_p0 }
  0x14   : > { %p1838_p12 = por %p151_p8, %p43_p3  ;;  %s171_s28 = sand.u32 1, %s1746_s17  }
  0x15   : > { %s2176_s26 = scalar_select %p1834_p11, 1, 0 }
  0x16   : > { %s2177_s27 = scalar_select %p1838_p12, 1, 0 }
  0x17   : > { %s1844_s29 = sshll.u32 %s1750_s18, 10  ;;  %s1848_s30 = sshll.u32 %s171_s28, 6 }
  0x18   : > { %p1850_p13 = pnand %p1517_p10, %p39_p5  ;;  %s192_s6 = sand.u32 1, %s1750_s18  }
  0x19   : > { %s2179_s1 = sld [smem:[#allocation13_spill]]  ;;  %s196_s10 = scalar_lea.vmem [#allocation5], %s1848_s30 }
  0x1a   : > { %s203_s11 = sshll.u32 %s196_s10, 4  ;;  %s1865_s12 = scalar_lea.sflag [#allocation6], %s192_s6  ;;  %s1862_s11 = int_to_ptr.vmem [resolvable:$true] %s203_s11 }
  0x1b   : > { %p1871_p2 = pneg %p1850_p13 }
  0x1f   : > { %s1859_s9 = scalar_lea.hbm %s2179_s1, %s1844_s29  ;;  %s1595_s23 = scalar_lea.hbm %s2179_s1, 2048 }
  0x20   : > { %s1590_s13 = scalar_lea.hbm %s1859_s9, 1024  ;;  %p1596_p5 = scmp.lt.u32.totalorder %s1859_s9, %s2179_s1 }
  0x21   : > { %p1591_p1 = scmp.ne.s32.totalorder %s1859_s9, %s1590_s13  ;;  %p1597_p7 = scmp.lt.u32.totalorder %s1595_s23, %s1590_s13 }
  0x22   : > { %p1599_p10 = scmp.lt.u32.totalorder %s1590_s13, %s1859_s9 }
  0x23   : > { %p1593_p3 = pnand %p1871_p2, %p1591_p1  ;;  %p1598_p8 = por %p1597_p7, %p1596_p5 }
  0x25   : > { %p1594_p4 = pneg %p1593_p3  ;;  %p1600_p9 = por %p1599_p10, %p1598_p8 }
  0x27   : > { %p1601_p0 = pnand %p1600_p9, %p1594_p4 }
  0x29   : > { %1604 = shalt.err (!%p1601_p0)
}
  0x2a   : > { %s1605_s6 = scalar_lea.vmem %s1862_s11, 1024  ;;  %s1752_s10 = smov [#allocation5]  }
  0x2b   : > { %p1606_p1 = scmp.ne.s32.totalorder %s1862_s11, %s1605_s6  ;;  %s1610_s20 = sshll.u32 %s1752_s10, 4  ;;  %s1611_s20 = int_to_ptr.vmem [resolvable:$false] %s1610_s20 }
  0x2c   : > { %s1612_s22 = scalar_lea.vmem %s1611_s20, 2048  ;;  %p1613_p11 = scmp.lt.s32.totalorder %s1862_s11, %s1611_s20 }
  0x2d   : > { %p1608_p3 = pnand %p1606_p1, %p1871_p2  ;;  %p1614_p6 = scmp.lt.s32.totalorder %s1612_s22, %s1605_s6 }
  0x2f   : > { %p1609_p12 = pneg %p1608_p3  ;;  %p1615_p5 = por %p1614_p6, %p1613_p11 }
  0x31   : > { %p1616_p7 = pnand %p1615_p5, %p1609_p12 }
  0x33   : > { %1619 = shalt.err (!%p1616_p7)
}
  0x34   : > { %s2169_s13 = smov 128   ;;  %s2171_s23 = smov 8  }
  0x35   : > { %1509 = dma.hbm_to_vmem [thread:$0]  (!%p1850_p13), %s1859_s9, 1024, %s1862_s11, %s1865_s12, %s2169_s13, %s2169_s13, %s2171_s23  }
  0x36   : > { %p238_p6 = scmp.lt.s32.totalorder %s1750_s18, 3  ;;  %s2181_s0 = sld [smem:[#allocation12_spill]] }
  0x37   : > { %p2182_p9 = scmp.ge.s32.totalorder %s1750_s18, 1  ;;  %s175_s20 = scalar_lea.vmem [#allocation2], %s1848_s30 }
  0x38   : > { %s182_s22 = sshll.u32 %s175_s20, 4  ;;  %s1916_s9 = scalar_lea.sflag [#allocation3], %s171_s28  ;;  %s1912_s22 = int_to_ptr.vmem [resolvable:$true] %s182_s22 }
  0x39   : > { %p1907_p11 = pnand %p2182_p9, %p238_p6 }
  0x3b   : > { %s2183_s10 = scalar_select %p1907_p11, 1, 0 }
  0x3c   : > { %s1903_s6 = scalar_lea.hbm %s2181_s0, %s1844_s29  ;;  %s1625_s13 = scalar_lea.hbm %s2181_s0, 2048 }
  0x3d   : > { %s1620_s11 = scalar_lea.hbm %s1903_s6, 1024  ;;  %p1626_p8 = scmp.lt.u32.totalorder %s1903_s6, %s2181_s0 }
  0x3e   : > { %p1621_p12 = scmp.ne.s32.totalorder %s1903_s6, %s1620_s11  ;;  %p1627_p10 = scmp.lt.u32.totalorder %s1625_s13, %s1620_s11 }
  0x3f   : > { %p1629_p3 = scmp.lt.u32.totalorder %s1620_s11, %s1903_s6 }
  0x40   : > { %p1623_p0 = pnand %p1621_p12, %p1871_p2  ;;  %p1628_p1 = por %p1627_p10, %p1626_p8 }
  0x42   : > { %p1624_p4 = pneg %p1623_p0  ;;  %p1630_p5 = por %p1629_p3, %p1628_p1 }
  0x44   : > { %p1631_p7 = pnand %p1630_p5, %p1624_p4 }
  0x46   : > { %1634 = shalt.err (!%p1631_p7)
}
  0x47   : > { %s1635_s28 = scalar_lea.vmem %s1912_s22, 1024  ;;  %s1755_s20 = smov [#allocation2]  }
  0x48   : > { %p1636_p6 = scmp.ne.s32.totalorder %s1912_s22, %s1635_s28  ;;  %s1640_s7 = sshll.u32 %s1755_s20, 4  ;;  %s1641_s7 = int_to_ptr.vmem [resolvable:$false] %s1640_s7 }
  0x49   : > { %s1642_s1 = scalar_lea.vmem %s1641_s7, 2048  ;;  %p1643_p0 = scmp.lt.s32.totalorder %s1912_s22, %s1641_s7 }
  0x4a   : > { %p1638_p9 = pnand %p1636_p6, %p1871_p2  ;;  %p1644_p11 = scmp.lt.s32.totalorder %s1642_s1, %s1635_s28 }
  0x4c   : > { %p1639_p12 = pneg %p1638_p9  ;;  %p1645_p8 = por %p1644_p11, %p1643_p0 }
  0x4e   : > { %p1646_p10 = pnand %p1645_p8, %p1639_p12 }
  0x50   : > { %1649 = shalt.err (!%p1646_p10)
}
  0x51   : > { %s2184_s13 = smov 8   ;;  %s2185_s23 = smov 128  }
  0x52   : > { %1506 = dma.hbm_to_vmem [thread:$0]  (!%p1850_p13), %s1903_s6, 1024, %s1912_s22, %s1916_s9, %s2185_s23, %s2185_s23, %s2184_s13  }
  0x53   : > { %s1947_s20 = scalar_lea.hbm %s2164_s2, %s1844_s29  ;;  %s217_s28 = scalar_lea.vmem [#allocation7], %s1848_s30 }
  0x54   : > { %s224_s7 = sshll.u32 %s217_s28, 4  ;;  %s1650_s1 = scalar_lea.hbm %s1947_s20, 1024  ;;  %s1950_s7 = int_to_ptr.vmem [resolvable:$true] %s224_s7 }
  0x55   : > { %p1651_p11 = scmp.ne.s32.totalorder %s1947_s20, %s1650_s1  ;;  %s1655_s22 = scalar_lea.hbm %s2164_s2, 2048 }
  0x56   : > { %p1656_p3 = scmp.lt.u32.totalorder %s1947_s20, %s2164_s2  ;;  %p1657_p5 = scmp.lt.u32.totalorder %s1655_s22, %s1650_s1 }
  0x57   : > { %p1653_p4 = pnand %p1651_p11, %p1871_p2  ;;  %p1659_p6 = scmp.lt.u32.totalorder %s1650_s1, %s1947_s20 }
  0x58   : > { %p1658_p7 = por %p1657_p5, %p1656_p3 }
  0x59   : > { %p1654_p1 = pneg %p1653_p4 }
  0x5a   : > { %p1660_p9 = por %p1659_p6, %p1658_p7 }
  0x5c   : > { %p1661_p12 = pnand %p1660_p9, %p1654_p1 }
  0x5e   : > { %1664 = shalt.err (!%p1661_p12)
}
  0x5f   : > { %s1665_s30 = scalar_lea.vmem %s1950_s7, 1024  ;;  %s1756_s0 = smov [#allocation7]  }
  0x60   : > { %p1666_p0 = scmp.ne.s32.totalorder %s1950_s7, %s1665_s30  ;;  %s1670_s11 = sshll.u32 %s1756_s0, 4  ;;  %s1671_s11 = int_to_ptr.vmem [resolvable:$false] %s1670_s11 }
  0x61   : > { %s1672_s8 = scalar_lea.vmem %s1671_s11, 2048  ;;  %p1673_p11 = scmp.lt.s32.totalorder %s1950_s7, %s1671_s11 }
  0x62   : > { %p1668_p8 = pnand %p1666_p0, %p1871_p2  ;;  %p1674_p4 = scmp.lt.s32.totalorder %s1672_s8, %s1665_s30 }
  0x64   : > { %p1669_p10 = pneg %p1668_p8  ;;  %p1675_p3 = por %p1674_p4, %p1673_p11 }
  0x66   : > { %p1676_p5 = pnand %p1675_p3, %p1669_p10 }
  0x68   : > { %1679 = shalt.err (!%p1676_p5)
}
  0x69   : > { %1512 = dma.hbm_to_vmem [thread:$0]  (!%p1850_p13), %s1947_s20, 1024, %s1950_s7, %s1865_s12, %s2185_s23, %s2185_s23, %s2184_s13  }
  0x6a   : > { %p2186_p2 = scmp.ne.s32.totalorder %s2183_s10, 0 }
  0x6b   : > { %s1980_s14 = sand.u32 (!%p2186_p2), 1, %s1742_s16   ;;  %p2187_p1 = scmp.ne.s32.totalorder (!%p2186_p2), %s2175_s25, 0 }
  0x6c   : > { %242 = sbr.rel (%p2186_p2) target bundleno = 2629 (0xa45), region = 36  ;;  %s1983_s28 = sshll.u32 (!%p2186_p2), %s1980_s14, 6 }
  0x6d   : > { %s245_s5 = scalar_lea.sflag (!%p2186_p2), [#allocation3], %s1980_s14  ;;  %s1987_s1 = scalar_lea.vmem (!%p2186_p2), [#allocation2], %s1983_s28 }
  0x73   : > { %1725 = dma.done.wait (%p2187_p1), %s245_s5, 1024  }
  0x74   : > { %1727 = vsyncadd (%p2187_p1), %s245_s5, 4294966272  ;;  %s253_s12 = sand.u32 1, %s1809_s19   ;;  %s1995_s13 = scalar_lea.vmem [#allocation5], %s1983_s28 }
  0x75   : > { %s254_s10 = scalar_lea.sflag [#allocation6], %s253_s12 }
  0x76   : > { %1729 = dma.done.wait (%p2187_p1), %s254_s10, 2048  }
  0x77   : > { %1731 = vsyncadd (%p2187_p1), %s254_s10, 4294965248  ;;  %vm314_vm0 = vcmask 261120   ;;  %v310_v1 = vld [vmem:[%s1995_s13] sm:$0xff]  ;;  %v311_v2 = vld [vmem:[%s1995_s13 + $0x8] sm:$0xff]  ;;  %p304_p13 = scmp.lt.s32.totalorder %s1809_s19, 1  ;;  %vm412_vm2 = vcmask 130048  }
  0x78   : > { %vm2003_vm1 = vmpackc.low %vm314_vm0, %vm314_vm0  ;;  %v308_v3 = vld [vmem:[%s1987_s1] sm:$0xff]  ;;  %v1455_v4 = vpack.c.bf16 %v311_v2, %v310_v1  ;;  %v309_v5 = vld [vmem:[%s1987_s1 + $0x8] sm:$0xff]  ;;  %s2031_s6 = scalar_lea.vmem [#allocation7], %s1983_s28  ;;  %s1757_s22 = smov 32   ;;  %vm1151_vm3 = vcmask 523264   ;;  %vm1154_vm4 = vcmask 785408  }
  0x79   : > { %1403 = vmatprep.mubr.msk.f32.mxu0 %vm314_vm0, %v308_v3  ;;  %s305_s25 = scalar_select %p304_p13, %s1809_s19, 1  ;;  %v312_v25 = vld [vmem:[%s2031_s6] sm:$0xff]  ;;  %v313_v26 = vld [vmem:[%s2031_s6 + $0x8] sm:$0xff]  ;;  %v1324_v28 = vld [vmem:[%s1995_s13 + $0x10] sm:$0xff] }
  0x7a   : > { %1457 = vmatprep.subr.msk.bf16.mxu0 %vm2003_vm1, %v1455_v4  ;;  %v1461_v27 = vpack.c.bf16 %v313_v26, %v312_v25  ;;  %v1325_v29 = vld [vmem:[%s1995_s13 + $0x18] sm:$0xff]  ;;  %v1322_v37 = vld [vmem:[%s1987_s1 + $0x10] sm:$0xff]  ;;  %v1336_v62 = vld [vmem:[%s1995_s13 + $0x20] sm:$0xff]  ;;  %s1758_s9 = smov 64   ;;  %s1759_s29 = smov 96  }
  0x7b   : > { %1460 = vmatpush3.bf16.xpose.msk.msra.mxu0 %vm2003_vm1, %v1455_v4  ;;  %s306_s7 = scalar_lea.vmem %s2165_s3, %s305_s25  ;;  %v1465_v30 = vpack.c.bf16 %v1325_v29, %v1324_v28  ;;  %v1323_v38 = vld [vmem:[%s1987_s1 + $0x18] sm:$0xff]  ;;  %v1326_v59 = vld [vmem:[%s2031_s6 + $0x10] sm:$0xff]  ;;  %v1337_v63 = vld [vmem:[%s1995_s13 + $0x28] sm:$0xff]  ;;  %s1314_s30 = sshll.u32 %s1980_s14, 4 }
  0x7c   : > { %v2022_v8 = vld [vmem:[%s306_s7] ss:$0 sm:$0xff]  ;;  %1462 = vmatprep.subr.bf16.mxu1 %v1461_v27  ;;  %v1327_v60 = vld [vmem:[%s2031_s6 + $0x18] sm:$0xff]  ;;  %v1475_v1 = vpack.c.bf16 %v1337_v63, %v1336_v62  ;;  %s303_s0 = scalar_lea.vmem [#allocation8], %s1314_s30  ;;  %s1366_s8 = sshll.u32 %s1809_s19, 8 }
  0x7d   : > { %1464 = vmatpush3.bf16.msra.mxu1 %v1461_v27  ;;  %v1471_v61 = vpack.c.bf16 %v1327_v60, %v1326_v59  ;;  %s1173_s11 = sshll.u32 %s303_s0, 4  ;;  %s1160_s19 = scalar_lea.sflag [#allocation4], %s1980_s14  ;;  %s2111_s11 = int_to_ptr.vmem [resolvable:$true] %s1173_s11 }
  0x7e   : > { %1467 = vmatprep.subr.msk.bf16.mxu1 %vm2003_vm1, %v1465_v30  ;;  %s1680_s12 = scalar_lea.vmem %s2111_s11, 256  ;;  %p2190_p6 = scmp.ne.s32.totalorder %s2176_s26, 0 }
  0x7f   : > { %1472 = vmatprep.subr.bf16.mxu0 %v1471_v61  ;;  %p1681_p7 = scmp.ne.s32.totalorder %s2111_s11, %s1680_s12  ;;  %s1760_s10 = smov [#allocation8]  }
  0x81   : > { %p1682_p9 = pnand %p1681_p7, %p2190_p6 }
  0x82   : > { %1404 = vmatmul.mubr.msk.f32.vlgmr.msra.gmra.mrb[0].mxu0 %vm314_vm0, %v309_v5 }
  0x83   : > { %1474 = vmatpush3.bf16.msra.mxu0 %v1471_v61  ;;  %p1683_p12 = pneg %p1682_p9 }
  0x84   : > { %1477 = vmatprep.subr.msk.bf16.mxu0 %vm2003_vm1, %v1475_v1 }
 0x155   : > { %v1405_v6 = vpop.f32.mrb[0].mxu0 }
 0x156   : > { %v393_v7 = vpop.f32.mrb[1].mxu0  ;;  %v403_v9 = vmul.f32 0.17677669, %v1405_v6 }
 0x157   : > { %v402_v10 = vmul.f32 0.17677669, %v393_v7 }
 0x158   : > { %v411_v13 = vadd.f32 %v2022_v8, %v403_v9  ;;  %v1334_v9 = vld [vmem:[%s1987_s1 + $0x20] sm:$0xff] }
 0x159   : > { %v410_v11 = vadd.f32 %v2022_v8, %v402_v10  ;;  %v1335_v10 = vld [vmem:[%s1987_s1 + $0x28] sm:$0xff] }
 0x15a   : > { %v416_v14 = vsel %vm412_vm2, %v411_v13, -inf }
 0x15b   : > { %v413_v12 = vsel %vm412_vm2, %v410_v11, -inf }
 0x15c   : > { %414 = vmax.xlane.f32.xlu0 %v413_v12 }
 0x160   : > { %417 = vmax.xlane.f32.xlu0 %v416_v14 }
 0x1e9   : > { %v415_v15 = vpop.xlane.xlu0 %414 }
 0x1ea   : > { %v419_v16 = vsub.f32 %v410_v11, %v415_v15 }
 0x1ec   : > { %v421_v17 = vmul.f32 1.442695, %v419_v16 }
 0x1ed   : > { %v418_v18 = vpop.xlane.xlu0 %417 }
 0x1ee   : > { %1558 = vpow2.f32 %v421_v17  ;;  %v420_v19 = vsub.f32 %v411_v13, %v418_v18 }
 0x1f0   : > { %v423_v20 = vmul.f32 1.442695, %v420_v19 }
 0x1f2   : > { %1560 = vpow2.f32 %v423_v20 }
 0x1f8   : > { %v1559_v21 = vpop.eup %1558 }
 0x1f9   : > { %v425_v22 = vsel %vm412_vm2, %v1559_v21, 0.0 }
 0x1fa   : > { %426 = vadd.xlane.f32.xlu1 %v425_v22 }
 0x1fc   : > { %v1561_v23 = vpop.eup %1560 }
 0x1fd   : > { %v428_v24 = vsel %vm412_vm2, %v1561_v23, 0.0 }
 0x1fe   : > { %429 = vadd.xlane.f32.xlu1 %v428_v24 }
 0x287   : > { %v427_v31 = vpop.xlane.xlu1 %426 }
 0x288   : > { %1562 = vrcp.f32 %v427_v31  ;;  %v1338_v31 = vld [vmem:[%s2031_s6 + $0x20] sm:$0xff] }
 0x28b   : > { %v430_v32 = vpop.xlane.xlu1 %429 }
 0x28c   : > { %1564 = vrcp.f32 %v430_v32  ;;  %v1339_v32 = vld [vmem:[%s2031_s6 + $0x28] sm:$0xff] }
 0x292   : > { %v1563_v33 = vpop.eup %1562 }
 0x293   : > { %v433_v34 = vmul.f32 %v1563_v33, %v1559_v21  ;;  %v1481_v33 = vpack.c.bf16 %v1339_v32, %v1338_v31 }
 0x295   : > { %1410 = vmatprep.mubr.msk.f32.mxu1 %vm412_vm2, %v433_v34  ;;  %v1348_v34 = vld [vmem:[%s1995_s13 + $0x30] sm:$0xff] }
 0x296   : > { %v1565_v35 = vpop.eup %1564 }
 0x297   : > { %v434_v36 = vmul.f32 %v1565_v35, %v1561_v23  ;;  %v1349_v35 = vld [vmem:[%s1995_s13 + $0x38] sm:$0xff]  ;;  %s1684_s13 = sshll.u32 %s1760_s10, 4  ;;  %s1685_s13 = int_to_ptr.vmem [resolvable:$false] %s1684_s13 }
 0x298   : > { %s1686_s25 = scalar_lea.vmem %s1685_s13, 512  ;;  %p1687_p0 = scmp.lt.s32.totalorder %s2111_s11, %s1685_s13 }
 0x299   : > { %1411 = vmatmul.mubr.msk.f32.vlgmr.msra.gmra.mrb[0].mxu1 %vm412_vm2, %v434_v36  ;;  %v1485_v36 = vpack.c.bf16 %v1349_v35, %v1348_v34  ;;  %p1688_p8 = scmp.lt.s32.totalorder %s1686_s25, %s1680_s12 }
 0x29a   : > { %1470 = vmatpush3.bf16.xpose.msk.msra.mxu1 %vm2003_vm1, %v1465_v30  ;;  %1417 = vmatprep.mubr.msk.f32.mxu1 %vm314_vm0, %v1322_v37 }
 0x29b   : > { %1482 = vmatprep.subr.bf16.mxu1 %v1481_v33  ;;  %p1689_p10 = por %p1688_p8, %p1687_p0 }
 0x29d   : > { %p1690_p11 = pnand %p1689_p10, %p1683_p12 }
 0x2a1   : > { %1418 = vmatmul.mubr.msk.f32.vlgmr.msra.gmra.mrb[2].mxu1 %vm314_vm0, %v1323_v38 }
 0x2a2   : > { %1484 = vmatpush3.bf16.msra.mxu1 %v1481_v33 }
 0x2a3   : > { %1487 = vmatprep.subr.msk.bf16.mxu1 %vm2003_vm1, %v1485_v36 }
 0x36c   : > { %v2047_v39 = vpop.f32.mrb[0].mxu1 }
 0x36d   : > { %v2049_v40 = vpop.f32.mrb[1].mxu1 }
 0x374   : > { %v1419_v41 = vpop.f32.mrb[2].mxu1 }
 0x375   : > { %v613_v42 = vmul.f32 0.17677669, %v1419_v41  ;;  %v603_v43 = vpop.f32.mrb[3].mxu1 }
 0x376   : > { %v612_v44 = vmul.f32 0.17677669, %v603_v43 }
 0x377   : > { %v615_v45 = vadd.f32 %v2022_v8, %v613_v42 }
 0x378   : > { %v614_v46 = vadd.f32 %v2022_v8, %v612_v44 }
 0x379   : > { %v619_v47 = vsel %vm412_vm2, %v615_v45, -inf }
 0x37a   : > { %620 = vmax.xlane.f32.xlu1 %v619_v47  ;;  %v616_v48 = vsel %vm412_vm2, %v614_v46, -inf }
 0x37b   : > { %617 = vmax.xlane.f32.xlu0 %v616_v48 }
 0x407   : > { %v621_v49 = vpop.xlane.xlu1 %620 }
 0x408   : > { %v623_v50 = vsub.f32 %v615_v45, %v621_v49  ;;  %v618_v51 = vpop.xlane.xlu0 %617  ;;  %v1346_v45 = vld [vmem:[%s1987_s1 + $0x30] sm:$0xff] }
 0x409   : > { %v622_v52 = vsub.f32 %v614_v46, %v618_v51  ;;  %v1347_v46 = vld [vmem:[%s1987_s1 + $0x38] sm:$0xff]  ;;  %s2118_s1 = scalar_lea.hbm %s2166_s4, %s1366_s8 }
 0x40a   : > { %v626_v53 = vmul.f32 1.442695, %v623_v50 }
 0x40b   : > { %v624_v54 = vmul.f32 1.442695, %v622_v52 }
 0x40c   : > { %1566 = vpow2.f32 %v626_v53 }
 0x40d   : > { %1568 = vpow2.f32 %v624_v54 }
 0x416   : > { %v1567_v55 = vpop.eup %1566 }
 0x417   : > { %v1569_v56 = vpop.eup %1568  ;;  %v631_v57 = vsel %vm412_vm2, %v1567_v55, 0.0 }
 0x418   : > { %632 = vadd.xlane.f32.xlu1 %v631_v57  ;;  %v628_v58 = vsel %vm412_vm2, %v1569_v56, 0.0 }
 0x419   : > { %629 = vadd.xlane.f32.xlu0 %v628_v58 }
 0x4a5   : > { %v633_v2 = vpop.xlane.xlu1 %632 }
 0x4a6   : > { %1570 = vrcp.f32 %v633_v2  ;;  %v630_v3 = vpop.xlane.xlu0 %629  ;;  %v1350_v2 = vld [vmem:[%s2031_s6 + $0x30] sm:$0xff] }
 0x4a7   : > { %1572 = vrcp.f32 %v630_v3  ;;  %v1351_v3 = vld [vmem:[%s2031_s6 + $0x38] sm:$0xff] }
 0x4b0   : > { %v1571_v4 = vpop.eup %1570 }
 0x4b1   : > { %v1573_v5 = vpop.eup %1572  ;;  %v637_v7 = vmul.f32 %v1571_v4, %v1567_v55  ;;  %v1491_v4 = vpack.c.bf16 %v1351_v3, %v1350_v2 }
 0x4b2   : > { %v636_v6 = vmul.f32 %v1573_v5, %v1569_v56 }
 0x4b4   : > { %1424 = vmatprep.mubr.msk.f32.mxu0 %vm412_vm2, %v636_v6 }
 0x4b5   : > { %1425 = vmatmul.mubr.msk.f32.vlgmr.msra.gmra.mrb[2].mxu0 %vm412_vm2, %v637_v7 }
 0x4b6   : > { %1480 = vmatpush3.bf16.xpose.msk.msra.mxu0 %vm2003_vm1, %v1475_v1  ;;  %1431 = vmatprep.mubr.msk.f32.mxu0 %vm314_vm0, %v1334_v9 }
 0x4b7   : > { %1492 = vmatprep.subr.bf16.mxu0 %v1491_v4 }
 0x4bd   : > { %1432 = vmatmul.mubr.msk.f32.vlgmr.msra.gmra.mrb[4].mxu0 %vm314_vm0, %v1335_v10 }
 0x4be   : > { %1494 = vmatpush3.bf16.msra.mxu0 %v1491_v4 }
 0x588   : > { %v2071_v11 = vpop.f32.mrb[2].mxu0 }
 0x589   : > { %v2073_v12 = vpop.f32.mrb[3].mxu0 }
 0x590   : > { %v1433_v13 = vpop.f32.mrb[4].mxu0 }
 0x591   : > { %v816_v14 = vmul.f32 0.17677669, %v1433_v13  ;;  %v806_v15 = vpop.f32.mrb[5].mxu0 }
 0x592   : > { %v815_v16 = vmul.f32 0.17677669, %v806_v15 }
 0x593   : > { %v818_v17 = vadd.f32 %v2022_v8, %v816_v14 }
 0x594   : > { %v817_v18 = vadd.f32 %v2022_v8, %v815_v16 }
 0x595   : > { %v822_v19 = vsel %vm412_vm2, %v818_v17, -inf }
 0x596   : > { %823 = vmax.xlane.f32.xlu1 %v822_v19  ;;  %v819_v20 = vsel %vm412_vm2, %v817_v18, -inf }
 0x597   : > { %820 = vmax.xlane.f32.xlu0 %v819_v20 }
 0x623   : > { %v824_v21 = vpop.xlane.xlu1 %823 }
 0x624   : > { %v826_v22 = vsub.f32 %v818_v17, %v824_v21  ;;  %v821_v23 = vpop.xlane.xlu0 %820 }
 0x625   : > { %v825_v24 = vsub.f32 %v817_v18, %v821_v23 }
 0x626   : > { %v829_v25 = vmul.f32 1.442695, %v826_v22 }
 0x627   : > { %v827_v26 = vmul.f32 1.442695, %v825_v24 }
 0x628   : > { %1574 = vpow2.f32 %v829_v25 }
 0x629   : > { %1576 = vpow2.f32 %v827_v26 }
 0x632   : > { %v1575_v27 = vpop.eup %1574 }
 0x633   : > { %v1577_v28 = vpop.eup %1576  ;;  %v834_v29 = vsel %vm412_vm2, %v1575_v27, 0.0 }
 0x634   : > { %835 = vadd.xlane.f32.xlu1 %v834_v29  ;;  %v831_v30 = vsel %vm412_vm2, %v1577_v28, 0.0 }
 0x635   : > { %832 = vadd.xlane.f32.xlu0 %v831_v30 }
 0x6c1   : > { %v836_v37 = vpop.xlane.xlu1 %835 }
 0x6c2   : > { %1578 = vrcp.f32 %v836_v37  ;;  %v833_v38 = vpop.xlane.xlu0 %832 }
 0x6c3   : > { %1580 = vrcp.f32 %v833_v38 }
 0x6cc   : > { %v1579_v41 = vpop.eup %1578 }
 0x6cd   : > { %v1581_v42 = vpop.eup %1580  ;;  %v840_v44 = vmul.f32 %v1579_v41, %v1575_v27 }
 0x6ce   : > { %v839_v43 = vmul.f32 %v1581_v42, %v1577_v28 }
 0x6d0   : > { %1438 = vmatprep.mubr.msk.f32.mxu1 %vm412_vm2, %v839_v43 }
 0x6d1   : > { %1439 = vmatmul.mubr.msk.f32.vlgmr.msra.gmra.mrb[4].mxu1 %vm412_vm2, %v840_v44 }
 0x6d2   : > { %1490 = vmatpush3.bf16.xpose.msk.msra.mxu1 %vm2003_vm1, %v1485_v36  ;;  %1445 = vmatprep.mubr.msk.f32.mxu1 %vm314_vm0, %v1346_v45 }
 0x6d9   : > { %1446 = vmatmul.mubr.msk.f32.vlgmr.msra.gmra.mrb[6].mxu1 %vm314_vm0, %v1347_v46 }
 0x7a4   : > { %v1440_v47 = vpop.f32.mrb[4].mxu1 }
 0x7a5   : > { %v913_v48 = vpop.f32.mrb[5].mxu1 }
 0x7ac   : > { %v1447_v49 = vpop.f32.mrb[6].mxu1 }
 0x7ad   : > { %v1019_v50 = vmul.f32 0.17677669, %v1447_v49  ;;  %v1009_v51 = vpop.f32.mrb[7].mxu1 }
 0x7ae   : > { %v1018_v52 = vmul.f32 0.17677669, %v1009_v51 }
 0x7af   : > { %v1021_v53 = vadd.f32 %v2022_v8, %v1019_v50 }
 0x7b0   : > { %v1020_v54 = vadd.f32 %v2022_v8, %v1018_v52 }
 0x7b1   : > { %v1025_v55 = vsel %vm412_vm2, %v1021_v53, -inf }
 0x7b2   : > { %1026 = vmax.xlane.f32.xlu1 %v1025_v55  ;;  %v1022_v0 = vsel %vm412_vm2, %v1020_v54, -inf }
 0x7b3   : > { %1023 = vmax.xlane.f32.xlu0 %v1022_v0 }
 0x83f   : > { %v1027_v56 = vpop.xlane.xlu1 %1026 }
 0x840   : > { %v1029_v57 = vsub.f32 %v1021_v53, %v1027_v56  ;;  %v1024_v58 = vpop.xlane.xlu0 %1023 }
 0x841   : > { %v1028_v59 = vsub.f32 %v1020_v54, %v1024_v58 }
 0x842   : > { %v1032_v60 = vmul.f32 1.442695, %v1029_v57 }
 0x843   : > { %v1030_v61 = vmul.f32 1.442695, %v1028_v59 }
 0x844   : > { %1582 = vpow2.f32 %v1032_v60 }
 0x845   : > { %1584 = vpow2.f32 %v1030_v61 }
 0x84e   : > { %v1583_v62 = vpop.eup %1582 }
 0x84f   : > { %v1585_v63 = vpop.eup %1584  ;;  %v1037_v8 = vsel %vm412_vm2, %v1583_v62, 0.0 }
 0x850   : > { %1038 = vadd.xlane.f32.xlu1 %v1037_v8  ;;  %v1034_v1 = vsel %vm412_vm2, %v1585_v63, 0.0 }
 0x851   : > { %1035 = vadd.xlane.f32.xlu0 %v1034_v1 }
 0x861   : > { %1129 = vrot.lane.b32.xlu1 %v2071_v11, %s1757_s22 }
 0x865   : > { %1135 = vrot.lane.b32.xlu1 %v913_v48, %s1758_s9 }
 0x867   : > { %1127 = vrot.lane.b32.xlu0 %v2073_v12, %s1757_s22 }
 0x869   : > { %1137 = vrot.lane.b32.xlu1 %v1440_v47, %s1758_s9 }
 0x8dd   : > { %v1039_v5 = vpop.xlane.xlu1 %1038 }
 0x8de   : > { %1586 = vrcp.f32 %v1039_v5  ;;  %v1036_v6 = vpop.xlane.xlu0 %1035 }
 0x8df   : > { %1588 = vrcp.f32 %v1036_v6 }
 0x8e1   : > { %v1130_v14 = vpop.permute.xlu1 %1129 }
 0x8e2   : > { %v1128_v17 = vpop.permute.xlu0 %1127  ;;  %v1150_v18 = vsel %vm314_vm0, %v2047_v39, %v1130_v14 }
 0x8e3   : > { %v1149_v19 = vsel %vm314_vm0, %v2049_v40, %v1128_v17 }
 0x8e5   : > { %v1136_v15 = vpop.permute.xlu1 %1135 }
 0x8e6   : > { %v1152_v22 = vsel %vm1151_vm3, %v1149_v19, %v1136_v15 }
 0x8e8   : > { %v1587_v7 = vpop.eup %1586 }
 0x8e9   : > { %v1589_v9 = vpop.eup %1588  ;;  %v1043_v11 = vmul.f32 %v1587_v7, %v1583_v62  ;;  %v1138_v16 = vpop.permute.xlu1 %1137 }
 0x8ea   : > { %v1042_v10 = vmul.f32 %v1589_v9, %v1585_v63  ;;  %v1153_v20 = vsel %vm1151_vm3, %v1150_v18, %v1138_v16 }
 0x8ec   : > { %1452 = vmatprep.mubr.msk.f32.mxu0 %vm412_vm2, %v1042_v10 }
 0x8ed   : > { %1453 = vmatmul.mubr.msk.f32.vlgmr.msra.gmra.mrb[6].mxu0 %vm412_vm2, %v1043_v11 }
 0x9c0   : > { %v1454_v13 = vpop.f32.mrb[6].mxu0 }
 0x9c1   : > { %1145 = vrot.lane.b32.xlu1 %v1454_v13, %s1759_s29  ;;  %v1116_v12 = vpop.f32.mrb[7].mxu0 }
 0x9c2   : > { %1143 = vrot.lane.b32.xlu0 %v1116_v12, %s1759_s29 }
 0xa33   : > { %v1146_v21 = vpop.permute.xlu1 %1145 }
 0xa34   : > { %v1156_v23 = vsel %vm1154_vm4, %v1153_v20, %v1146_v21  ;;  %v1144_v24 = vpop.permute.xlu0 %1143 }
 0xa35   : > { %1158 = vst [vmem:[%s303_s0 + $0x8] sm:$0xff] %v1156_v23  ;;  %v1155_v39 = vsel %vm1154_vm4, %v1152_v22, %v1144_v24 }
 0xa36   : > { %1157 = vst [vmem:[%s303_s0] sm:$0xff] %v1155_v39 }
 0xa37   : > { %1693 = shalt.err (!%p1690_p11)
}
 0xa38   : > { %s1694_s23 = scalar_lea.hbm %s2118_s1, 256  ;;  %s1698_s6 = scalar_lea.hbm %s2166_s4, 512 }
 0xa39   : > { %p1695_p4 = scmp.ne.s32.totalorder %s2118_s1, %s1694_s23  ;;  %p1699_p2 = scmp.lt.u32.totalorder %s2118_s1, %s2166_s4 }
 0xa3a   : > { %p1700_p1 = scmp.lt.u32.totalorder %s1698_s6, %s1694_s23  ;;  %p1702_p7 = scmp.lt.u32.totalorder %s1694_s23, %s2118_s1 }
 0xa3b   : > { %p1696_p3 = pnand %p1695_p4, %p2190_p6 }
 0xa3c   : > { %p1701_p13 = por %p1700_p1, %p1699_p2 }
 0xa3d   : > { %p1697_p5 = pneg %p1696_p3 }
 0xa3e   : > { %p1703_p9 = por %p1702_p7, %p1701_p13 }
 0xa40   : > { %p1704_p12 = pnand %p1703_p9, %p1697_p5 }
 0xa42   : > { %1707 = shalt.err (!%p1704_p12)
}
 0xa43   : > { %s1761_s29 = smov 128   ;;  %s1762_s30 = smov 8  }
 0xa44   : > { %1501 = dma.vmem_to_hbm [thread:$0]  (%p2190_p6), %s2111_s11, 256, %s2118_s1, %s1160_s19, %s1761_s29, %s1761_s29, %s1762_s30  }
 0xa45 PF: > { %s1188_s0 = sand.u32 1, %s1738_s15   ;;  %p2191_p0 = scmp.ne.s32.totalorder %s2177_s27, 0 }
 0xa46   : > { %p2192_p8 = scmp.ge.s32.totalorder %s1750_s18, 2  ;;  %s1189_s8 = scalar_lea.sflag [#allocation4], %s1188_s0 }
 0xa48   : > { %p1514_p10 = pnand %p2192_p8, %p2191_p0 }
 0xa4a   : > { %1733 = dma.done.wait (!%p1514_p10), %s1189_s8, 256  }
 0xa4b   : > { %1735 = vsyncadd (!%p1514_p10), %s1189_s8, 4294967040  ;;  %p20_p11 = scmp.ge.s32.totalorder %s1813_s21, 4   ;;  %s2193_s15 = smov %s1742_s16 }
 0xa4c   : > { %s2194_s16 = smov %s1746_s17  ;;  %s2195_s17 = smov %s1825_s24 }
 0xa4d   : > { %s2196_s18 = smov %s1813_s21  ;;  %22 = sbr.rel (!%p20_p11) target bundleno = 10 (0xa), region = 117 }
 0xa54   :  { %1194 = vsyncpa [#allocation3], 1 }
 0xa55   :  { %1196 = vsyncpa [#allocation3 + $0x1], 1 }
 0xa56   :  { %1197 = vsyncpa [#allocation6], 1 }
 0xa57   :  { %1199 = vsyncpa [#allocation6 + $0x1], 1 }
 0xa58   :  { %1200 = vsyncpa [#allocation4], 1 }
 0xa59   :  { %1202 = vsyncpa [#allocation4 + $0x1], 1 }

</bundles_post_ra>
